<compile_context>
chip_gen: v7x
topology: tpu7x:2x2x1
jax: 0.10.0
libtpu: 0.0.40
codegen_flags: <defaults>
</compile_context>

<pallas_src>
import functools

import jax
import jax.numpy as jnp
from jax.experimental import pallas as pl
from jax.experimental.pallas import tpu as pltpu


def _round_up(x: int, m: int) -> int:
    return (x + m - 1) // m * m


def _similarity_kernel(fs_ref, ft_ref, out_ref, gs_ref, gt_ref, l1_ref, *,
                       batch: int, d_orig: int):
    """One grid step consumes a (B, tk) slab of both feature tensors."""
    i = pl.program_id(0)

    @pl.when(i == 0)
    def _init():
        gs_ref[...] = jnp.zeros_like(gs_ref)
        gt_ref[...] = jnp.zeros_like(gt_ref)
        l1_ref[...] = jnp.zeros_like(l1_ref)

    fs = fs_ref[...].astype(jnp.float32)          # (B, tk)
    ft = ft_ref[...].astype(jnp.float32)          # (B, tk)

    # Partial Gram matrices: f @ f.T contribution of this D-slab (MXU).
    dn = (((1,), (1,)), ((), ()))                 # contract last dim of both
    gs_ref[...] += jax.lax.dot_general(fs, fs, dn,
                                       preferred_element_type=jnp.float32)
    gt_ref[...] += jax.lax.dot_general(ft, ft, dn,
                                       preferred_element_type=jnp.float32)

    # SmoothL1 (beta = 1.0) element-sum contribution of this slab.
    d = fs - ft
    ad = jnp.abs(d)
    huber = jnp.where(ad < 1.0, 0.5 * d * d, ad - 0.5)
    l1_ref[...] += jnp.sum(jnp.sum(huber, axis=1, keepdims=True),
                           axis=0, keepdims=True)          # (1, 1)

    @pl.when(i == pl.num_programs(0) - 1)
    def _finalize():
        eps = jnp.float32(1e-12)
        gs = gs_ref[...]
        gt = gt_ref[...]
        # Row-wise L2 normalization, matching torch.nn.functional.normalize.
        gs_n = gs / jnp.maximum(
            jnp.sqrt(jnp.sum(gs * gs, axis=1, keepdims=True)), eps)
        gt_n = gt / jnp.maximum(
            jnp.sqrt(jnp.sum(gt * gt, axis=1, keepdims=True)), eps)
        diff = gt_n - gs_n
        sim = jnp.sum(jnp.sum(diff * diff, axis=1, keepdims=True),
                      axis=0, keepdims=True)                # (1, 1)
        out_ref[...] = (sim * jnp.float32(1.0 / (batch * batch))
                        + l1_ref[...] * jnp.float32(1.0 / (batch * d_orig)))


def similarity_loss(g_s: jax.Array, g_t: jax.Array) -> jax.Array:
    """Pallas TPU implementation of Similarity.forward."""
    assert g_s.shape == g_t.shape and g_s.ndim >= 2
    B = g_s.shape[0]
    f_s = g_s.reshape(B, -1)
    f_t = g_t.reshape(B, -1)
    D = f_s.shape[1]
    itemsize = jnp.dtype(f_s.dtype).itemsize

    # --- Tile sizing from an explicit VMEM budget (v7x has 64 MiB/TC). ---
    try:
        vmem_cap = int(pltpu.get_tpu_info().vmem_capacity_bytes)
    except Exception:
        vmem_cap = 64 * 1024 * 1024          # conservative (v7x) floor
    buf_budget = int(vmem_cap * 0.6)         # for the double-buffered inputs

    B_pad = _round_up(B, 8)                  # sublane padding of each tile
    per_col = 4 * B_pad * itemsize           # 2 inputs x 2 pipeline buffers
    tk_cap = max(128, (buf_budget // per_col) // 128 * 128)

    D_128 = _round_up(D, 128)
    if D_128 <= tk_cap:
        tk, n_tiles = D_128, 1
    else:
        n_tiles = -(-D_128 // tk_cap)                       # cdiv
        tk = _round_up(-(-D_128 // n_tiles), 128)           # balanced tiles
    D_pad = tk * n_tiles

    if D_pad != D:
        # Zero columns contribute nothing to Gram or SmoothL1 sums.
        pad = ((0, 0), (0, D_pad - D))
        f_s = jnp.pad(f_s, pad)
        f_t = jnp.pad(f_t, pad)

    # Raise the scoped-VMEM limit so the large tiles are actually accepted,
    # while leaving headroom for scratch / compiler internals.
    vmem_limit = int(min(buf_budget + (16 << 20), vmem_cap - (8 << 20)))
    vmem_limit = max(vmem_limit, 32 << 20)

    kernel = functools.partial(_similarity_kernel, batch=B, d_orig=D)

    out = pl.pallas_call(
        kernel,
        out_shape=jax.ShapeDtypeStruct((1, 1), jnp.float32),
        grid_spec=pltpu.PrefetchScalarGridSpec(
            num_scalar_prefetch=0,
            grid=(n_tiles,),
            in_specs=[
                pl.BlockSpec((B, tk), lambda i: (0, i)),
                pl.BlockSpec((B, tk), lambda i: (0, i)),
            ],
            out_specs=pl.BlockSpec((1, 1), lambda i: (0, 0)),
            scratch_shapes=[
                pltpu.VMEM((B, B), jnp.float32),   # Gram accumulator (student)
                pltpu.VMEM((B, B), jnp.float32),   # Gram accumulator (teacher)
                pltpu.VMEM((1, 1), jnp.float32),   # SmoothL1 sum accumulator
            ],
        ),
        compiler_params=pltpu.CompilerParams(
            dimension_semantics=("arbitrary",),    # reduction over D tiles
            vmem_limit_bytes=vmem_limit,
        ),
    )(f_s, f_t)
    return out[0, 0]


def similarity_ref(g_s, g_t):
    """Pure-JAX reference for verification."""
    B = g_s.shape[0]
    f_s = g_s.reshape(B, -1).astype(jnp.float32)
    f_t = g_t.reshape(B, -1).astype(jnp.float32)

    def row_normalize(G):
        n = jnp.sqrt(jnp.sum(G * G, axis=1, keepdims=True))
        return G / jnp.maximum(n, 1e-12)

    G_s = row_normalize(f_s @ f_s.T)
    G_t = row_normalize(f_t @ f_t.T)
    diff = G_t - G_s
    sim = jnp.sum(diff * diff) / (B * B)

    d = f_s - f_t
    ad = jnp.abs(d)
    huber = jnp.where(ad < 1.0, 0.5 * d * d, ad - 0.5)
    return sim + jnp.mean(huber)


if __name__ == "__main__":
    B, C, H, W = 2, 4, 16, 16        # small feature maps, D = C*H*W = 1024

    key = jax.random.PRNGKey(0)
    k_s, k_t = jax.random.split(key)
    g_s = jax.random.normal(k_s, (B, C, H, W), dtype=jnp.float32) * 1.5
    g_t = jax.random.normal(k_t, (B, C, H, W), dtype=jnp.float32) * 1.5

    loss = similarity_loss(g_s, g_t)
    loss = jax.block_until_ready(loss)

    ref = similarity_ref(g_s, g_t)
    assert jnp.allclose(loss, ref, rtol=2e-3, atol=2e-3), (loss, ref)

    print("KERNEL_OK")
</pallas_src>

<mosaic_0001>
module attributes {stable_mosaic.version = 11 : i64} {
  func.func @_similarity_kernel(%arg0: i32, %arg1: memref<2x1024xf32, #tpu.memory_space<vmem>>, %arg2: memref<2x1024xf32, #tpu.memory_space<vmem>>, %arg3: memref<1x1xf32, #tpu.memory_space<vmem>>, %arg4: memref<2x2xf32, #tpu.memory_space<vmem>>, %arg5: memref<2x2xf32, #tpu.memory_space<vmem>>, %arg6: memref<1x1xf32, #tpu.memory_space<vmem>>) attributes {dimension_semantics = [#tpu.dimension_semantics<arbitrary>], iteration_bounds = array<i64: 1>, scalar_prefetch = 0 : i64, scratch_operands = 3 : i64, tpu.core_type = #tpu.core_type<tc>, window_params = [{transform_indices = @transform_0, window_bounds = array<i64: 2, 1024>}, {transform_indices = @transform_1, window_bounds = array<i64: 2, 1024>}, {pipeline_mode = #tpu.pipeline_mode<synchronous>, transform_indices = @transform_2, window_bounds = array<i64: 1, 1>}]} {
    %c0_i32 = arith.constant 0 : i32
    %0 = arith.cmpi eq, %arg0, %c0_i32 : i32
    %1 = arith.extui %0 : i1 to i32
    %c0_i32_0 = arith.constant 0 : i32
    %2 = arith.cmpi ne, %1, %c0_i32_0 : i32
    scf.if %2 {
      %cst_24 = arith.constant 0.000000e+00 : f32
      %33 = vector.broadcast %cst_24 : f32 to vector<2x2xf32>
      %c0_25 = arith.constant 0 : index
      %c0_26 = arith.constant 0 : index
      %34 = vector.load %arg4[%c0_25, %c0_26] : memref<2x2xf32, #tpu.memory_space<vmem>>, vector<2x2xf32>
      tpu.vector_store %arg4[%c0_25, %c0_26], %33 {strides = array<i32>} : memref<2x2xf32, #tpu.memory_space<vmem>>, vector<2x2xf32>,
      %cst_27 = arith.constant 0.000000e+00 : f32
      %35 = vector.broadcast %cst_27 : f32 to vector<2x2xf32>
      %c0_28 = arith.constant 0 : index
      %c0_29 = arith.constant 0 : index
      %36 = vector.load %arg5[%c0_28, %c0_29] : memref<2x2xf32, #tpu.memory_space<vmem>>, vector<2x2xf32>
      tpu.vector_store %arg5[%c0_28, %c0_29], %35 {strides = array<i32>} : memref<2x2xf32, #tpu.memory_space<vmem>>, vector<2x2xf32>,
      %cst_30 = arith.constant 0.000000e+00 : f32
      %37 = vector.broadcast %cst_30 : f32 to vector<1x1xf32>
      %c0_31 = arith.constant 0 : index
      %c0_32 = arith.constant 0 : index
      %38 = vector.load %arg6[%c0_31, %c0_32] : memref<1x1xf32, #tpu.memory_space<vmem>>, vector<1x1xf32>
      tpu.vector_store %arg6[%c0_31, %c0_32], %37 {strides = array<i32>} : memref<1x1xf32, #tpu.memory_space<vmem>>, vector<1x1xf32>,
    } else {
    }
    %c0 = arith.constant 0 : index
    %c0_1 = arith.constant 0 : index
    %3 = vector.load %arg1[%c0, %c0_1] : memref<2x1024xf32, #tpu.memory_space<vmem>>, vector<2x1024xf32>
    %c0_2 = arith.constant 0 : index
    %c0_3 = arith.constant 0 : index
    %4 = vector.load %arg2[%c0_2, %c0_3] : memref<2x1024xf32, #tpu.memory_space<vmem>>, vector<2x1024xf32>
    %c0_4 = arith.constant 0 : index
    %c0_5 = arith.constant 0 : index
    %5 = vector.load %arg4[%c0_4, %c0_5] : memref<2x2xf32, #tpu.memory_space<vmem>>, vector<2x2xf32>
    %cst = arith.constant dense<0.000000e+00> : vector<2x2xf32>
    %6 = tpu.matmul %3, %3, %cst {dimension_numbers = #tpu.dot_dimension_numbers<[1], [1], [0], [0], [0, 0, 1, 0], [], []>} : vector<2x1024xf32>, vector<2x1024xf32>, vector<2x2xf32> -> vector<2x2xf32>
    %7 = arith.addf %5, %6 : vector<2x2xf32>
    %c0_6 = arith.constant 0 : index
    %c0_7 = arith.constant 0 : index
    %8 = vector.load %arg4[%c0_6, %c0_7] : memref<2x2xf32, #tpu.memory_space<vmem>>, vector<2x2xf32>
    tpu.vector_store %arg4[%c0_6, %c0_7], %7 {strides = array<i32>} : memref<2x2xf32, #tpu.memory_space<vmem>>, vector<2x2xf32>,
    %c0_8 = arith.constant 0 : index
    %c0_9 = arith.constant 0 : index
    %9 = vector.load %arg5[%c0_8, %c0_9] : memref<2x2xf32, #tpu.memory_space<vmem>>, vector<2x2xf32>
    %cst_10 = arith.constant dense<0.000000e+00> : vector<2x2xf32>
    %10 = tpu.matmul %4, %4, %cst_10 {dimension_numbers = #tpu.dot_dimension_numbers<[1], [1], [0], [0], [0, 0, 1, 0], [], []>} : vector<2x1024xf32>, vector<2x1024xf32>, vector<2x2xf32> -> vector<2x2xf32>
    %11 = arith.addf %9, %10 : vector<2x2xf32>
    %c0_11 = arith.constant 0 : index
    %c0_12 = arith.constant 0 : index
    %12 = vector.load %arg5[%c0_11, %c0_12] : memref<2x2xf32, #tpu.memory_space<vmem>>, vector<2x2xf32>
    tpu.vector_store %arg5[%c0_11, %c0_12], %11 {strides = array<i32>} : memref<2x2xf32, #tpu.memory_space<vmem>>, vector<2x2xf32>,
    %13 = arith.subf %3, %4 : vector<2x1024xf32>
    %14 = math.absf %13 : vector<2x1024xf32>
    %cst_13 = arith.constant 1.000000e+00 : f32
    %15 = vector.broadcast %cst_13 : f32 to vector<2x1024xf32>
    %16 = arith.cmpf olt, %14, %15 : vector<2x1024xf32>
    %cst_14 = arith.constant 5.000000e-01 : f32
    %17 = vector.broadcast %cst_14 : f32 to vector<2x1024xf32>
    %18 = arith.mulf %17, %13 : vector<2x1024xf32>
    %19 = arith.mulf %18, %13 : vector<2x1024xf32>
    %cst_15 = arith.constant 5.000000e-01 : f32
    %20 = vector.broadcast %cst_15 : f32 to vector<2x1024xf32>
    %21 = arith.subf %14, %20 : vector<2x1024xf32>
    %22 = arith.select %16, %19, %21 : vector<2x1024xi1>, vector<2x1024xf32>
    %c0_16 = arith.constant 0 : index
    %c0_17 = arith.constant 0 : index
    %23 = vector.load %arg6[%c0_16, %c0_17] : memref<1x1xf32, #tpu.memory_space<vmem>>, vector<1x1xf32>
    %cst_18 = arith.constant dense<0.000000e+00> : vector<2xf32>
    %24 = vector.multi_reduction <add>, %22, %cst_18 [1] : vector<2x1024xf32> to vector<2xf32>
    %25 = vector.shape_cast %24 : vector<2xf32> to vector<2x1xf32>
    %cst_19 = arith.constant dense<0.000000e+00> : vector<1xf32>
    %26 = vector.multi_reduction <add>, %25, %cst_19 [0] : vector<2x1xf32> to vector<1xf32>
    %27 = vector.shape_cast %26 : vector<1xf32> to vector<1x1xf32>
    %28 = arith.addf %23, %27 : vector<1x1xf32>
    %c0_20 = arith.constant 0 : index
    %c0_21 = arith.constant 0 : index
    %29 = vector.load %arg6[%c0_20, %c0_21] : memref<1x1xf32, #tpu.memory_space<vmem>>, vector<1x1xf32>
    tpu.vector_store %arg6[%c0_20, %c0_21], %28 {strides = array<i32>} : memref<1x1xf32, #tpu.memory_space<vmem>>, vector<1x1xf32>,
    %c0_i32_22 = arith.constant 0 : i32
    %30 = arith.cmpi eq, %arg0, %c0_i32_22 : i32
    %31 = arith.extui %30 : i1 to i32
    %c0_i32_23 = arith.constant 0 : i32
    %32 = arith.cmpi ne, %31, %c0_i32_23 : i32
    scf.if %32 {
      %c0_24 = arith.constant 0 : index
      %c0_25 = arith.constant 0 : index
      %33 = vector.load %arg4[%c0_24, %c0_25] : memref<2x2xf32, #tpu.memory_space<vmem>>, vector<2x2xf32>
      %c0_26 = arith.constant 0 : index
      %c0_27 = arith.constant 0 : index
      %34 = vector.load %arg5[%c0_26, %c0_27] : memref<2x2xf32, #tpu.memory_space<vmem>>, vector<2x2xf32>
      %35 = arith.mulf %33, %33 : vector<2x2xf32>
      %cst_28 = arith.constant dense<0.000000e+00> : vector<2xf32>
      %36 = vector.multi_reduction <add>, %35, %cst_28 [1] : vector<2x2xf32> to vector<2xf32>
      %37 = vector.shape_cast %36 : vector<2xf32> to vector<2x1xf32>
      %38 = math.sqrt %37 : vector<2x1xf32>
      %cst_29 = arith.constant 9.99999996E-13 : f32
      %39 = vector.broadcast %cst_29 : f32 to vector<2x1xf32>
      %40 = arith.maximumf %38, %39 : vector<2x1xf32>
      %41 = vector.broadcast %40 : vector<2x1xf32> to vector<2x2xf32>
      %42 = arith.divf %33, %41 : vector<2x2xf32>
      %43 = arith.mulf %34, %34 : vector<2x2xf32>
      %cst_30 = arith.constant dense<0.000000e+00> : vector<2xf32>
      %44 = vector.multi_reduction <add>, %43, %cst_30 [1] : vector<2x2xf32> to vector<2xf32>
      %45 = vector.shape_cast %44 : vector<2xf32> to vector<2x1xf32>
      %46 = math.sqrt %45 : vector<2x1xf32>
      %cst_31 = arith.constant 9.99999996E-13 : f32
      %47 = vector.broadcast %cst_31 : f32 to vector<2x1xf32>
      %48 = arith.maximumf %46, %47 : vector<2x1xf32>
      %49 = vector.broadcast %48 : vector<2x1xf32> to vector<2x2xf32>
      %50 = arith.divf %34, %49 : vector<2x2xf32>
      %51 = arith.subf %50, %42 : vector<2x2xf32>
      %52 = arith.mulf %51, %51 : vector<2x2xf32>
      %cst_32 = arith.constant dense<0.000000e+00> : vector<2xf32>
      %53 = vector.multi_reduction <add>, %52, %cst_32 [1] : vector<2x2xf32> to vector<2xf32>
      %54 = vector.shape_cast %53 : vector<2xf32> to vector<2x1xf32>
      %cst_33 = arith.constant dense<0.000000e+00> : vector<1xf32>
      %55 = vector.multi_reduction <add>, %54, %cst_33 [0] : vector<2x1xf32> to vector<1xf32>
      %56 = vector.shape_cast %55 : vector<1xf32> to vector<1x1xf32>
      %cst_34 = arith.constant 2.500000e-01 : f32
      %57 = vector.broadcast %cst_34 : f32 to vector<1x1xf32>
      %58 = arith.mulf %56, %57 : vector<1x1xf32>
      %c0_35 = arith.constant 0 : index
      %c0_36 = arith.constant 0 : index
      %59 = vector.load %arg6[%c0_35, %c0_36] : memref<1x1xf32, #tpu.memory_space<vmem>>, vector<1x1xf32>
      %cst_37 = arith.constant 4.8828125E-4 : f32
      %60 = vector.broadcast %cst_37 : f32 to vector<1x1xf32>
      %61 = arith.mulf %59, %60 : vector<1x1xf32>
      %62 = arith.addf %58, %61 : vector<1x1xf32>
      %c0_38 = arith.constant 0 : index
      %c0_39 = arith.constant 0 : index
      %63 = vector.load %arg3[%c0_38, %c0_39] : memref<1x1xf32, #tpu.memory_space<vmem>>, vector<1x1xf32>
      tpu.vector_store %arg3[%c0_38, %c0_39], %62 {strides = array<i32>} : memref<1x1xf32, #tpu.memory_space<vmem>>, vector<1x1xf32>,
    } else {
    }
    return
  }
  func.func @transform_0(%arg0: i32) -> (i32, i32) {
    %c0_i32 = arith.constant 0 : i32
    %c0_i32_0 = arith.constant 0 : i32
    return %c0_i32, %arg0 : i32, i32
  }
  func.func @transform_1(%arg0: i32) -> (i32, i32) {
    %c0_i32 = arith.constant 0 : i32
    %c0_i32_0 = arith.constant 0 : i32
    return %c0_i32, %arg0 : i32, i32
  }
  func.func @transform_2(%arg0: i32) -> (i32, i32) {
    %c0_i32 = arith.constant 0 : i32
    %c0_i32_0 = arith.constant 0 : i32
    %c0_i32_1 = arith.constant 0 : i32
    return %c0_i32, %c0_i32_0 : i32, i32
  }
}

</mosaic_0001>

<bundles_post_ra>
// kernel: tpu_custom_call.1
= control target key start
LH: loop header
LB: loop body
LE: loop exit
PB: predicated region body
PF: predicated region fallthrough
CT: control target
= control target key end

     0   :  { %7 = vsyncpa [#allocation6], 0  ;;  %s1061_s0 = inlined_call_operand.hbm [shape: f32[2,1024], index: 0, kind: input, shape index: {}]   ;;  %s1062_s1 = inlined_call_operand.hbm [shape: f32[2,1024], index: 1, kind: input, shape index: {}]   ;;  %s1063_s2 = inlined_call_operand.hbm [shape: f32[1,1], index: 2, kind: output, shape index: {}]  }
   0x1   :  { %8 = vsyncpa [#allocation9], 0 }
   0x2   :  { %9 = vsyncpa [#allocation7], 0  ;;  %s948_s9 = smov [#allocation5]   ;;  %s949_s11 = smov [#allocation8]  }
   0x3   :  { %s16_s10 = sshll.u32 %s948_s9, 4  ;;  %s26_s12 = sshll.u32 %s949_s11, 4  ;;  %s17_s10 = int_to_ptr.vmem [resolvable:$true] %s16_s10  ;;  %s27_s12 = int_to_ptr.vmem [resolvable:$true] %s26_s12 }
   0x4   :  { %s876_s15 = scalar_lea.hbm %s1061_s0, 256 }
   0x5   :  { %p877_p0 = scmp.ne.s32.totalorder %s1061_s0, %s876_s15  ;;  %p880_p1 = scmp.lt.u32.totalorder %s876_s15, %s1061_s0 }
   0x7   :  { %p882_p2 = pnand %p880_p1, %p877_p0 }
   0x9   :  { %885 = shalt.err (!%p882_p2)
}
   0xa   :  { %s886_s20 = scalar_lea.vmem %s17_s10, 256  ;;  %p891_p4 = scmp.lt.s32.totalorder %s17_s10, %s17_s10 }
   0xb   :  { %p887_p3 = scmp.ne.s32.totalorder %s17_s10, %s886_s20  ;;  %p892_p5 = scmp.lt.s32.totalorder %s886_s20, %s886_s20 }
   0xd   :  { %p893_p6 = por %p892_p5, %p891_p4 }
   0xf   :  { %p894_p7 = pnand %p893_p6, %p887_p3 }
  0x11   :  { %897 = shalt.err (!%p894_p7)
}
  0x12   :  { %19 = dma.hbm_to_vmem [thread:$0]  %s1061_s0, 256, %s17_s10, [#allocation6]  }
  0x13   :  { %s898_s25 = scalar_lea.hbm %s1062_s1, 256 }
  0x14   :  { %p899_p8 = scmp.ne.s32.totalorder %s1062_s1, %s898_s25  ;;  %p902_p9 = scmp.lt.u32.totalorder %s898_s25, %s1062_s1 }
  0x16   :  { %p904_p10 = pnand %p902_p9, %p899_p8 }
  0x18   :  { %907 = shalt.err (!%p904_p10)
}
  0x19   :  { %s908_s30 = scalar_lea.vmem %s27_s12, 256  ;;  %p913_p12 = scmp.lt.s32.totalorder %s27_s12, %s27_s12 }
  0x1a   :  { %p909_p11 = scmp.ne.s32.totalorder %s27_s12, %s908_s30  ;;  %p914_p13 = scmp.lt.s32.totalorder %s908_s30, %s908_s30 }
  0x1c   :  { %p915_p0 = por %p914_p13, %p913_p12 }
  0x1e   :  { %p916_p1 = pnand %p915_p0, %p909_p11 }
  0x20   :  { %919 = shalt.err (!%p916_p1)
}
  0x21   :  { %29 = dma.hbm_to_vmem [thread:$0]  %s1062_s1, 256, %s27_s12, [#allocation9]  }
  0x22   :  { %942 = dma.done.wait [#allocation6], 256  }
  0x23   :  { %943 = vsyncadd [#allocation6], 4294967040 }
  0x24   :  { %944 = dma.done.wait [#allocation9], 256  }
  0x25   :  { %945 = vsyncadd [#allocation9], 4294967040  ;;  %v56_v0 = vlaneseq  ;;  %v950_v1 = vmov 1983009808   ;;  %v45_v6 = vld [vmem:[#allocation5] sm:$0xff]  ;;  %v47_v7 = vld [vmem:[#allocation8] sm:$0xff] }
  0x26   :  { %v54_v2 = vunpack.c.l.s4 %v950_v1  ;;  %v46_v8 = vld [vmem:[#allocation5 + $0x8] sm:$0xff]  ;;  %v995_v10 = vsub.f32 %v45_v6, %v47_v7  ;;  %v52_v11 = vcombine.high %v45_v6, %v45_v6  ;;  %v380_v14 = vcombine.high %v47_v7, %v47_v7  ;;  %v48_v20 = vld [vmem:[#allocation8 + $0x8] sm:$0xff]  ;;  %s952_s1 = smov [#allocation10]  }
  0x27   :  { %v57_v3 = vshrl.u32 %v56_v0, 7  ;;  %v69_v13 = vcombine.high %v46_v8, %v46_v8  ;;  %v1002_v24 = vsub.f32 %v46_v8, %v48_v20  ;;  %v397_v27 = vcombine.high %v48_v20, %v48_v20  ;;  %s847_s4 = sshll.u32 %s952_s1, 4  ;;  %s848_s4 = int_to_ptr.vmem [resolvable:$true] %s847_s4 }
  0x28   :  { %v55_v4 = vunpack.c.0.s8 %v54_v2  ;;  %vm40_vm0 = vcmask 9216   ;;  %v951_v32 = vmov 0.0   ;;  %v706_v1 = vand.u32 2147483647, %v995_v10  ;;  %s920_s5 = scalar_lea.vmem %s848_s4, 16  ;;  %s924_s6 = scalar_lea.vmem %s848_s4, 32 }
  0x29   :  { %41 = vst.msk [vmem:[#allocation2] sm:$0x3] %vm40_vm0, %v951_v32  ;;  %42 = vst.msk [vmem:[#allocation3] sm:$0x3] %vm40_vm0, %v951_v32  ;;  %v710_v2 = vmul.f32 0.5, %v995_v10  ;;  %vm763_vm2 = vcmask 1041408   ;;  %p921_p2 = scmp.ne.s32.totalorder %s848_s4, %s920_s5  ;;  %p925_p3 = scmp.lt.s32.totalorder %s848_s4, %s848_s4 }
  0x2a   :  { %v992_v5 = vsub.s32 %v55_v4, %v57_v3  ;;  %v857_v4 = vadd.f32 -0.5, %v706_v1  ;;  %vm708_vm1 = vcmp.lt.f32.partialorder %v706_v1, 1.0  ;;  %vm43_vm8 = vcmask 0   ;;  %p926_p4 = scmp.lt.s32.totalorder %s924_s6, %s920_s5 }
  0x2b   :  { %v712_v3 = vmul.f32 %v710_v2, %v995_v10  ;;  %44 = vst.msk [vmem:[#allocation4] sm:$0x1] %vm43_vm8, %v951_v32 }
  0x2c   :  { %v59_v9 = vrot.slane %v45_v6, %v992_v5  ;;  %v76_v12 = vrot.slane %v46_v8, %v992_v5  ;;  %v66_v16 = vrot.slane %v52_v11, %v992_v5  ;;  %v387_v17 = vrot.slane %v47_v7, %v992_v5  ;;  %p927_p5 = por %p926_p4, %p925_p3 }
  0x2d   :  { %v83_v19 = vrot.slane %v69_v13, %v992_v5  ;;  %v394_v22 = vrot.slane %v380_v14, %v992_v5  ;;  %v404_v26 = vrot.slane %v48_v20, %v992_v5  ;;  %v411_v29 = vrot.slane %v397_v27, %v992_v5 }
  0x2e   :  { %v67_v15 = vcombine.high %v59_v9, %v59_v9  ;;  %v84_v18 = vcombine.high %v76_v12, %v76_v12  ;;  %v68_v21 = vcombine.high %v66_v16, %v66_v16  ;;  %v395_v25 = vcombine.high %v387_v17, %v387_v17  ;;  %p928_p6 = pnand %p927_p5, %p921_p2 }
  0x2f   :  { %v85_v23 = vcombine.high %v83_v19, %v83_v19  ;;  %v396_v28 = vcombine.high %v394_v22, %v394_v22  ;;  %v412_v30 = vcombine.high %v404_v26, %v404_v26  ;;  %v413_v31 = vcombine.high %v411_v29, %v411_v29 }
  0x30   :  { %94 = vmatprep.subr.mxu0 %v67_v15  ;;  %158 = vmatprep.mubr.f32.mxu0 %v67_v15  ;;  %v49_v41 = vld [vmem:[#allocation2] sm:$0x3]  ;;  %v377_v54 = vld [vmem:[#allocation3] sm:$0x3]  ;;  %v716_v6 = vsel %vm708_vm1, %v712_v3, %v857_v4  ;;  %v707_v11 = vand.u32 2147483647, %v1002_v24 }
  0x31   :  { %95 = vmatpush1.xpose.msra.mxu0 %v59_v9  ;;  %164 = vmatprep.subr.mxu1 %v68_v21  ;;  %v728_v7 = vrot.slane %v716_v6, %v992_v5  ;;  %v721_v8 = vcombine.high %v716_v6, %v716_v6 }
  0x32   :  { %234 = vmatprep.subr.mxu0 %v84_v18  ;;  %165 = vmatpush1.xpose.msra.mxu1 %v66_v16  ;;  %vm709_vm3 = vcmp.lt.f32.partialorder %v707_v11, 1.0  ;;  %v718_v3 = vld [vmem:[#allocation4] sm:$0x1] }
  0x33   :  { %228 = vmatprep.mubr.f32.mxu1 %v68_v21  ;;  %304 = vmatprep.subr.mxu1 %v85_v23  ;;  %v735_v13 = vrot.slane %v721_v8, %v992_v5  ;;  %v764_v14 = vsel %vm763_vm2, %v728_v7, 0.0 }
  0x34   :  { %159 = vmatmul.mubr.f32.vlgmr.msra.gmra.mrb[0].mxu0 %v59_v9  ;;  %v736_v9 = vcombine.high %v728_v7, %v728_v7 }
  0x35   :  { %235 = vmatpush1.xpose.msra.mxu0 %v76_v12  ;;  %298 = vmatprep.mubr.f32.mxu0 %v84_v18  ;;  %v737_v18 = vcombine.high %v735_v13, %v735_v13 }
  0x36   :  { %229 = vmatmul.mubr.f32.vlgmr.msra.gmra.mrb[0].mxu1 %v66_v16  ;;  %422 = vmatprep.subr.mxu0 %v395_v25  ;;  %v765_v15 = vsel %vm763_vm2, %v736_v9, 0.0  ;;  %v858_v16 = vadd.f32 -0.5, %v707_v11 }
  0x37   :  { %305 = vmatpush1.xpose.msra.mxu1 %v83_v19  ;;  %368 = vmatprep.mubr.f32.mxu1 %v85_v23  ;;  %v769_v23 = vsel %vm763_vm2, %v737_v18, 0.0 }
  0x38   :  { %299 = vmatmul.mubr.f32.vlgmr.msra.gmra.mrb[2].mxu0 %v76_v12  ;;  %492 = vmatprep.subr.mxu1 %v396_v28  ;;  %v711_v12 = vmul.f32 0.5, %v1002_v24 }
  0x39   :  { %423 = vmatpush1.xpose.msra.mxu0 %v387_v17  ;;  %486 = vmatprep.mubr.f32.mxu0 %v395_v25 }
  0x3a   :  { %369 = vmatmul.mubr.f32.vlgmr.msra.gmra.mrb[2].mxu1 %v83_v19  ;;  %562 = vmatprep.subr.mxu0 %v412_v30  ;;  %v713_v10 = vmul.f32 %v711_v12, %v1002_v24  ;;  %v767_v19 = vsel %vm763_vm2, %v735_v13, 0.0 }
  0x3b   :  { %493 = vmatpush1.xpose.msra.mxu1 %v394_v22  ;;  %556 = vmatprep.mubr.f32.mxu1 %v396_v28 }
  0x3c   :  { %487 = vmatmul.mubr.f32.vlgmr.msra.gmra.mrb[4].mxu0 %v387_v17  ;;  %632 = vmatprep.subr.mxu1 %v413_v31  ;;  %v766_v17 = vadd.f32 %v765_v15, %v764_v14  ;;  %v717_v20 = vsel %vm709_vm3, %v713_v10, %v858_v16 }
  0x3d   :  { %563 = vmatpush1.xpose.msra.mxu0 %v404_v26  ;;  %626 = vmatprep.mubr.f32.mxu0 %v412_v30 }
  0x3e   :  { %557 = vmatmul.mubr.f32.vlgmr.msra.gmra.mrb[4].mxu1 %v394_v22  ;;  %v768_v21 = vadd.f32 %v767_v19, %v766_v17  ;;  %v745_v22 = vrot.slane %v717_v20, %v992_v5 }
  0x3f   :  { %633 = vmatpush1.xpose.msra.mxu1 %v411_v29  ;;  %696 = vmatprep.mubr.f32.mxu1 %v413_v31 }
  0x40   :  { %627 = vmatmul.mubr.f32.vlgmr.msra.gmra.mrb[6].mxu0 %v404_v26  ;;  %v770_v25 = vadd.f32 %v769_v23, %v768_v21  ;;  %v738_v26 = vcombine.high %v717_v20, %v717_v20  ;;  %v753_v27 = vcombine.high %v745_v22, %v745_v22  ;;  %v771_v28 = vsel %vm763_vm2, %v745_v22, 0.0 }
  0x42   :  { %697 = vmatmul.mubr.f32.vlgmr.msra.gmra.mrb[6].mxu1 %v411_v29  ;;  %v772_v29 = vadd.f32 %v771_v28, %v770_v25  ;;  %v752_v24 = vrot.slane %v738_v26, %v992_v5  ;;  %v773_v30 = vsel %vm763_vm2, %v753_v27, 0.0 }
  0x44   :  { %v774_v31 = vadd.f32 %v773_v30, %v772_v29 }
 0x107   :  { %v160_v33 = vpop.f32.mrb[0].mxu0 }
 0x108   :  { %v162_v34 = vpop.f32.mrb[1].mxu0 }
 0x109   :  { %v230_v35 = vpop.f32.mrb[0].mxu1  ;;  %v775_v34 = vsel %vm763_vm2, %v752_v24, 0.0 }
 0x10a   :  { %v231_v36 = vadd.f32 %v230_v35, %v160_v33  ;;  %v232_v37 = vpop.f32.mrb[1].mxu1  ;;  %v754_v33 = vcombine.high %v752_v24, %v752_v24  ;;  %v776_v35 = vadd.f32 %v775_v34, %v774_v31 }
 0x10b   :  { %v300_v38 = vpop.f32.mrb[2].mxu0 }
 0x10c   :  { %v301_v39 = vadd.f32 %v300_v38, %v231_v36  ;;  %v302_v40 = vpop.f32.mrb[3].mxu0  ;;  %v777_v36 = vsel %vm763_vm2, %v754_v33, 0.0 }
 0x10d   :  { %v370_v42 = vpop.f32.mrb[2].mxu1  ;;  %v778_v37 = vadd.f32 %v777_v36, %v776_v35 }
 0x10e   :  { %v371_v43 = vadd.f32 %v370_v42, %v301_v39  ;;  %v372_v44 = vpop.f32.mrb[3].mxu1 }
 0x10f   :  { %v488_v45 = vpop.f32.mrb[4].mxu0  ;;  %779 = vadd.xlane.f32.xlu1 %v778_v37 }
 0x110   :  { %v374_v46 = vadd.f32 %v371_v43, %v49_v41  ;;  %v490_v47 = vpop.f32.mrb[5].mxu0 }
 0x111   :  { %v558_v48 = vpop.f32.mrb[4].mxu1 }
 0x112   :  { %376 = vst.msk [vmem:[#allocation2] sm:$0x3] %vm40_vm0, %v374_v46  ;;  %v559_v49 = vadd.f32 %v558_v48, %v488_v45  ;;  %v560_v50 = vpop.f32.mrb[5].mxu1 }
 0x113   :  { %v628_v51 = vpop.f32.mrb[6].mxu0 }
 0x114   :  { %v629_v52 = vadd.f32 %v628_v51, %v559_v49  ;;  %v630_v53 = vpop.f32.mrb[7].mxu0 }
 0x115   :  { %v698_v55 = vpop.f32.mrb[6].mxu1 }
 0x116   :  { %v699_v56 = vadd.f32 %v698_v55, %v629_v52  ;;  %v700_v57 = vpop.f32.mrb[7].mxu1 }
 0x118   :  { %v702_v58 = vadd.f32 %v699_v56, %v377_v54 }
 0x119   :  { %v1011_v59 = vld [vmem:[#allocation2] sm:$0x3] }
 0x11a   :  { %703 = vst.msk [vmem:[#allocation3] sm:$0x3] %vm40_vm0, %v702_v58  ;;  %v796_v60 = vmul.f32 %v1011_v59, %v1011_v59 }
 0x11c   :  { %v797_v61 = vsel %vm40_vm0, %v796_v60, 0.0 }
 0x11d   :  { %798 = vadd.xlane.f32.xlu0 %v797_v61 }
 0x121   :  { %v1017_v62 = vld [vmem:[#allocation3] sm:$0x3] }
 0x122   :  { %v810_v63 = vmul.f32 %v1017_v62, %v1017_v62 }
 0x124   :  { %v811_v0 = vsel %vm40_vm0, %v810_v63, 0.0 }
 0x125   :  { %812 = vadd.xlane.f32.xlu0 %v811_v0 }
 0x19c   :  { %v780_v57 = vpop.xlane.xlu1 %779 }
 0x19d   :  { %v781_v58 = vsel %vm763_vm2, %v780_v57, 0.0 }
 0x19e   :  { %v782_v61 = vrot.slane %v781_v58, 4 }
 0x1a0   :  { %v783_v63 = vadd.f32 %v782_v61, %v781_v58 }
 0x1a2   :  { %v784_v0 = vrot.slane %v783_v63, 2 }
 0x1a4   :  { %v785_v1 = vadd.f32 %v784_v0, %v783_v63 }
 0x1a6   :  { %v786_v2 = vrot.slane %v785_v1, 1 }
 0x1aa   :  { %v799_v38 = vpop.xlane.xlu0 %798 }
 0x1ab   :  { %868 = vrsqrt.f32 %v799_v38  ;;  %vm802_vm4 = vcmp.eq.f32.partialorder %v799_v38, inf  ;;  %v805_v5 = vand.u32 2147483648, %v799_v38  ;;  %vm804_vm5 = vcmp.eq.f32.partialorder %v799_v38, 0.0 }
 0x1b2   :  { %v813_v39 = vpop.xlane.xlu0 %812 }
 0x1b3   :  { %870 = vrsqrt.f32 %v813_v39  ;;  %vm816_vm6 = vcmp.eq.f32.partialorder %v813_v39, inf  ;;  %v819_v47 = vand.u32 2147483648, %v813_v39  ;;  %vm818_vm7 = vcmp.eq.f32.partialorder %v813_v39, 0.0 }
 0x1b5   :  { %v869_v40 = vpop.eup %868 }
 0x1b6   :  { %v801_v41 = vmul.f32 %v869_v40, %v799_v38 }
 0x1b8   :  { %v803_v42 = vsel %vm802_vm4, %v799_v38, %v801_v41 }
 0x1b9   :  { %v806_v43 = vsel %vm804_vm5, %v805_v5, %v803_v42 }
 0x1ba   :  { %v807_v45 = vmax.f32 %v806_v43, 1e-12 }
 0x1bc   :  { %872 = vrcp.f32 %v807_v45 }
 0x1bd   :  { %v871_v44 = vpop.eup %870 }
 0x1be   :  { %v815_v46 = vmul.f32 %v871_v44, %v813_v39 }
 0x1c0   :  { %v817_v48 = vsel %vm816_vm6, %v813_v39, %v815_v46 }
 0x1c1   :  { %v820_v49 = vsel %vm818_vm7, %v819_v47, %v817_v48 }
 0x1c2   :  { %v821_v50 = vmax.f32 %v820_v49, 1e-12 }
 0x1c4   :  { %874 = vrcp.f32 %v821_v50 }
 0x1c6   :  { %v873_v51 = vpop.eup %872 }
 0x1c7   :  { %v809_v53 = vmul.f32 %v873_v51, %v1011_v59  ;;  %v787_v59 = vadd.f32 %v786_v2, %v785_v1 }
 0x1ce   :  { %v875_v52 = vpop.eup %874 }
 0x1cf   :  { %v823_v54 = vmul.f32 %v875_v52, %v1017_v62  ;;  %v788_v62 = vadd.f32 %v787_v59, %v718_v3 }
 0x1d1   :  { %v824_v55 = vsub.f32 %v823_v54, %v809_v53  ;;  %790 = vst.msk [vmem:[#allocation4] sm:$0x1] %vm43_vm8, %v788_v62 }
 0x1d3   :  { %v825_v56 = vmul.f32 %v824_v55, %v824_v55 }
 0x1d5   :  { %v826_v60 = vsel %vm40_vm0, %v825_v56, 0.0 }
 0x1d6   :  { %827 = vadd.xlane.f32.xlu1 %v826_v60 }
 0x1d8   :  { %v837_v13 = vld [vmem:[#allocation4] sm:$0x1] }
 0x1d9   :  { %v838_v15 = vmul.f32 0.00048828125, %v837_v13 }
 0x263   :  { %v828_v4 = vpop.xlane.xlu1 %827 }
 0x264   :  { %v829_v6 = vsel %vm763_vm2, %v828_v4, 0.0 }
 0x265   :  { %v830_v7 = vrot.slane %v829_v6, 4 }
 0x267   :  { %v831_v8 = vadd.f32 %v830_v7, %v829_v6 }
 0x269   :  { %v832_v9 = vrot.slane %v831_v8, 2 }
 0x26b   :  { %v833_v11 = vadd.f32 %v832_v9, %v831_v8 }
 0x26d   :  { %v834_v12 = vrot.slane %v833_v11, 1 }
 0x26f   :  { %v835_v14 = vadd.f32 %v834_v12, %v833_v11 }
 0x271   :  { %v836_v32 = vmul.f32 0.25, %v835_v14 }
 0x273   :  { %v839_v10 = vadd.f32 %v838_v15, %v836_v32 }
 0x275   :  { %840 = vst.msk [vmem:[#allocation10] sm:$0x1] %vm43_vm8, %v839_v10 }
 0x276   :  { %931 = shalt.err (!%p928_p6)
}
 0x277   :  { %s932_s9 = scalar_lea.hbm %s1063_s2, 16 }
 0x278   :  { %p933_p7 = scmp.ne.s32.totalorder %s1063_s2, %s932_s9  ;;  %p936_p8 = scmp.lt.u32.totalorder %s932_s9, %s1063_s2 }
 0x27a   :  { %p938_p9 = pnand %p936_p8, %p933_p7 }
 0x27c   :  { %941 = shalt.err (!%p938_p9)
}
 0x27d   :  { %850 = dma.vmem_to_hbm [thread:$0]  %s848_s4, 16, %s1063_s2, [#allocation7]  }
 0x27e   :  { %946 = dma.done.wait [#allocation7], 16  }
 0x27f   :  { %947 = vsyncadd [#allocation7], 4294967280 }
 0x280   :  { %854 = vsyncpa [#allocation6], 1 }
 0x281   :  { %855 = vsyncpa [#allocation9], 1 }
 0x282   :  { %856 = vsyncpa [#allocation7], 1 }

</bundles_post_ra>
